<compile_context>
chip_gen: v7x
topology: tpu7x:2x2x1
jax: 0.10.0
libtpu: 0.0.40
codegen_flags: <defaults>
</compile_context>

<pallas_src>
import jax
import jax.numpy as jnp
from jax.experimental import pallas as pl
from jax.experimental.pallas import tpu as pltpu

_LANE = 128
_SUB = 8
_BLOCK_ROWS = 4096              # 4096 x 128 x 4 B = 2 MiB per f32 input block
_NUM_SHARDS = 2                 # megacore split (v7x); serial on 1-TC chips
_VMEM_LIMIT = 32 * 1024 * 1024  # covers 2 inputs x 2 buffers + intermediates on all chips
_EPS = 1e-6


def _make_kernel(block_rows, rows_valid, steps_per_shard, need_row_mask):
    def kernel(pred_ref, gt_ref, sum_ref, cnt_ref):
        s = pl.program_id(0)
        k = pl.program_id(1)

        @pl.when(k == 0)
        def _():
            sum_ref[...] = jnp.zeros_like(sum_ref)
            cnt_ref[...] = jnp.zeros_like(cnt_ref)

        def accumulate(extra_row_mask):
            # Load + upcast in VMEM (wrapper passes native dtype, so bf16 inputs
            # never get a full f32 copy written back to HBM).
            pred = jnp.maximum(pred_ref[...].astype(jnp.float32), 0.0)  # clamp(min=0)
            gt = gt_ref[...].astype(jnp.float32)
            # Single EUP log per element; exact divide keeps it within ~1 ulp of
            # log(pred+eps) - log(gt+eps).
            err = jnp.log((pred + _EPS) / (gt + _EPS))
            mask = gt > 0.0
            if extra_row_mask is not None:
                mask = mask & extra_row_mask
            # where (not multiply-by-mask): drops NaN/inf err coming from
            # gt <= -eps or from garbage rows of partial tail blocks.
            val = jnp.where(mask, err * err, 0.0)
            cnt = jnp.where(mask, 1.0, 0.0)
            # Fold the block into a vreg-shaped (1, 8, 128) partial: pure VPU
            # adds, no cross-lane reduce, no narrow stores in the hot loop.
            # Note: f32 counts are exact up to 2^24 per lane per shard.
            sum_ref[...] += val.reshape(-1, _SUB, _LANE).sum(axis=0, keepdims=True)
            cnt_ref[...] += cnt.reshape(-1, _SUB, _LANE).sum(axis=0, keepdims=True)

        if need_row_mask:
            blk = s * steps_per_shard + k                    # logical block index
            is_tail = (blk + 1) * block_rows > rows_valid    # partial / clamped-dup block

            @pl.when(jnp.logical_not(is_tail))
            def _():                                         # fast path: interior block
                accumulate(None)

            @pl.when(is_tail)
            def _():                                         # tail: mask rows past the array
                row0 = blk * block_rows
                rows_idx = row0 + jax.lax.broadcasted_iota(
                    jnp.int32, (block_rows, _LANE), 0)
                accumulate(rows_idx < rows_valid)
        else:
            accumulate(None)

    return kernel


@jax.jit
def mse_log_loss(prediction, gt):
    """Pallas implementation of MSE_log_loss.forward."""
    # No dtype cast here (cast happens in VMEM); broadcast is a no-op when the
    # shapes already match (the usual case for this loss).
    pred, gtb = jnp.broadcast_arrays(prediction, gt)
    p = pred.reshape(-1)   # flat view: free (metadata-only) in XLA
    g = gtb.reshape(-1)
    n = p.shape[0]

    # The kernel streams a (rows, 128) lane-major view.  The reshape is free
    # when n % 128 == 0; only inputs with a sub-128 ragged tail (or tiny inputs
    # with < 8 rows) pay a pad copy.  Padded gt is 0, so it is masked out.
    tile = _SUB * _LANE
    if n % _LANE != 0 or n < tile:
        n_pad = ((n + tile - 1) // tile) * tile
        p = jnp.pad(p, (0, n_pad - n))
        g = jnp.pad(g, (0, n_pad - n))
        n = n_pad

    rows = n // _LANE                    # >= 8
    p2 = p.reshape(rows, _LANE)
    g2 = g.reshape(rows, _LANE)

    # block_rows: multiple of 8 and <= rows; partial tail blocks (rows not a
    # multiple of block_rows) are masked in-kernel, so no row padding is needed.
    block_rows = min(_BLOCK_ROWS, (rows // _SUB) * _SUB)

    total_steps = (rows + block_rows - 1) // block_rows
    num_shards = min(_NUM_SHARDS, total_steps)
    steps_per_shard = (total_steps + num_shards - 1) // num_shards
    # Row mask is needed iff some logical block reaches past the real rows
    # (partial tail block and/or clamped-duplicate blocks of the last shard).
    need_row_mask = (num_shards * steps_per_shard * block_rows != rows)

    def in_idx(s_, k_):
        # Clamp over-range logical blocks of the last shard onto a valid block;
        # their contribution is zeroed by the in-kernel row mask.
        return (jnp.minimum(s_ * steps_per_shard + k_, total_steps - 1), 0)

    tile_spec = pl.BlockSpec((block_rows, _LANE), in_idx)
    out_spec = pl.BlockSpec((1, _SUB, _LANE), lambda s_, k_: (s_, 0, 0))

    sums, cnts = pl.pallas_call(
        _make_kernel(block_rows, rows, steps_per_shard, need_row_mask),
        out_shape=(
            jax.ShapeDtypeStruct((num_shards, _SUB, _LANE), jnp.float32),
            jax.ShapeDtypeStruct((num_shards, _SUB, _LANE), jnp.float32),
        ),
        grid=(num_shards, steps_per_shard),
        in_specs=[tile_spec, tile_spec],
        out_specs=(out_spec, out_spec),
        compiler_params=pltpu.CompilerParams(
            dimension_semantics=("parallel", "arbitrary"),
            vmem_limit_bytes=_VMEM_LIMIT),
    )(p2, g2)

    # Tiny epilogue: single cross-lane reduce of the per-shard partials.
    return jnp.sum(sums) / jnp.sum(cnts)


def _reference_mse_log(prediction, gt):
    """Pure-JAX reference matching the PyTorch forward exactly (two logs)."""
    pred = jnp.maximum(prediction.astype(jnp.float32), 0.0)
    gtf = gt.astype(jnp.float32)
    err = jnp.log(pred + _EPS) - jnp.log(gtf + _EPS)
    mask = gtf > 0.0
    sq = jnp.where(mask, err * err, 0.0)
    return jnp.sum(sq) / jnp.sum(mask.astype(jnp.float32))


if __name__ == "__main__":
    key = jax.random.PRNGKey(0)
    k1, k2 = jax.random.split(key)

    B, C, H, W = 2, 1, 16, 16
    prediction = jax.random.normal(k1, (B, C, H, W), dtype=jnp.float32)
    # gt: positive depths with ~1/3 invalid (zero) pixels that must be masked.
    gt = jnp.maximum(
        jax.random.uniform(k2, (B, C, H, W), minval=-1.0, maxval=2.0), 0.0
    ).astype(jnp.float32)

    out = jax.block_until_ready(mse_log_loss(prediction, gt))
    ref = jax.block_until_ready(_reference_mse_log(prediction, gt))

    assert jnp.isfinite(out), out
    assert jnp.allclose(out, ref, rtol=1e-5, atol=1e-5), (out, ref)
    print("KERNEL_OK")
</pallas_src>

<mosaic_0001>
module attributes {stable_mosaic.version = 11 : i64} {
  func.func @kernel(%arg0: i32, %arg1: i32, %arg2: memref<8x128xf32, #tpu.memory_space<vmem>>, %arg3: memref<8x128xf32, #tpu.memory_space<vmem>>, %arg4: memref<1x8x128xf32, #tpu.memory_space<vmem>>, %arg5: memref<1x8x128xf32, #tpu.memory_space<vmem>>) attributes {dimension_semantics = [#tpu.dimension_semantics<parallel>, #tpu.dimension_semantics<arbitrary>], iteration_bounds = array<i64: 1, 1>, scalar_prefetch = 0 : i64, scratch_operands = 0 : i64, tpu.core_type = #tpu.core_type<tc>, window_params = [{transform_indices = @transform_0, window_bounds = array<i64: 8, 128>}, {transform_indices = @transform_1, window_bounds = array<i64: 8, 128>}, {transform_indices = @transform_2, window_bounds = array<i64: 1, 8, 128>}, {transform_indices = @transform_3, window_bounds = array<i64: 1, 8, 128>}]} {
    %c0_i32 = arith.constant 0 : i32
    %0 = arith.cmpi eq, %arg1, %c0_i32 : i32
    %1 = arith.extui %0 : i1 to i32
    %c0_i32_0 = arith.constant 0 : i32
    %2 = arith.cmpi ne, %1, %c0_i32_0 : i32
    scf.if %2 {
      %cst_24 = arith.constant 0.000000e+00 : f32
      %33 = vector.broadcast %cst_24 : f32 to vector<1x8x128xf32>
      %c0_25 = arith.constant 0 : index
      %c0_26 = arith.constant 0 : index
      %c0_27 = arith.constant 0 : index
      %34 = vector.load %arg4[%c0_25, %c0_26, %c0_27] : memref<1x8x128xf32, #tpu.memory_space<vmem>>, vector<1x8x128xf32>
      tpu.vector_store %arg4[%c0_25, %c0_26, %c0_27], %33 {strides = array<i32>} : memref<1x8x128xf32, #tpu.memory_space<vmem>>, vector<1x8x128xf32>,
      %cst_28 = arith.constant 0.000000e+00 : f32
      %35 = vector.broadcast %cst_28 : f32 to vector<1x8x128xf32>
      %c0_29 = arith.constant 0 : index
      %c0_30 = arith.constant 0 : index
      %c0_31 = arith.constant 0 : index
      %36 = vector.load %arg5[%c0_29, %c0_30, %c0_31] : memref<1x8x128xf32, #tpu.memory_space<vmem>>, vector<1x8x128xf32>
      tpu.vector_store %arg5[%c0_29, %c0_30, %c0_31], %35 {strides = array<i32>} : memref<1x8x128xf32, #tpu.memory_space<vmem>>, vector<1x8x128xf32>,
    } else {
    }
    %c0 = arith.constant 0 : index
    %c0_1 = arith.constant 0 : index
    %3 = vector.load %arg2[%c0, %c0_1] : memref<8x128xf32, #tpu.memory_space<vmem>>, vector<8x128xf32>
    %cst = arith.constant 0.000000e+00 : f32
    %4 = vector.broadcast %cst : f32 to vector<8x128xf32>
    %5 = arith.maximumf %3, %4 : vector<8x128xf32>
    %c0_2 = arith.constant 0 : index
    %c0_3 = arith.constant 0 : index
    %6 = vector.load %arg3[%c0_2, %c0_3] : memref<8x128xf32, #tpu.memory_space<vmem>>, vector<8x128xf32>
    %cst_4 = arith.constant 9.99999997E-7 : f32
    %7 = vector.broadcast %cst_4 : f32 to vector<8x128xf32>
    %8 = arith.addf %5, %7 : vector<8x128xf32>
    %cst_5 = arith.constant 9.99999997E-7 : f32
    %9 = vector.broadcast %cst_5 : f32 to vector<8x128xf32>
    %10 = arith.addf %6, %9 : vector<8x128xf32>
    %11 = arith.divf %8, %10 : vector<8x128xf32>
    %12 = math.log %11 : vector<8x128xf32>
    %cst_6 = arith.constant 0.000000e+00 : f32
    %13 = vector.broadcast %cst_6 : f32 to vector<8x128xf32>
    %14 = arith.cmpf ogt, %6, %13 : vector<8x128xf32>
    %15 = arith.mulf %12, %12 : vector<8x128xf32>
    %cst_7 = arith.constant 0.000000e+00 : f32
    %16 = vector.broadcast %cst_7 : f32 to vector<8x128xf32>
    %17 = arith.select %14, %15, %16 : vector<8x128xi1>, vector<8x128xf32>
    %cst_8 = arith.constant 1.000000e+00 : f32
    %cst_9 = arith.constant 0.000000e+00 : f32
    %18 = vector.broadcast %cst_8 : f32 to vector<8x128xf32>
    %19 = vector.broadcast %cst_9 : f32 to vector<8x128xf32>
    %20 = arith.select %14, %18, %19 : vector<8x128xi1>, vector<8x128xf32>
    %c0_10 = arith.constant 0 : index
    %c0_11 = arith.constant 0 : index
    %c0_12 = arith.constant 0 : index
    %21 = vector.load %arg4[%c0_10, %c0_11, %c0_12] : memref<1x8x128xf32, #tpu.memory_space<vmem>>, vector<1x8x128xf32>
    %22 = vector.shape_cast %17 : vector<8x128xf32> to vector<1x8x128xf32>
    %cst_13 = arith.constant dense<0.000000e+00> : vector<8x128xf32>
    %23 = vector.multi_reduction <add>, %22, %cst_13 [0] : vector<1x8x128xf32> to vector<8x128xf32>
    %24 = vector.shape_cast %23 : vector<8x128xf32> to vector<1x8x128xf32>
    %25 = arith.addf %21, %24 : vector<1x8x128xf32>
    %c0_14 = arith.constant 0 : index
    %c0_15 = arith.constant 0 : index
    %c0_16 = arith.constant 0 : index
    %26 = vector.load %arg4[%c0_14, %c0_15, %c0_16] : memref<1x8x128xf32, #tpu.memory_space<vmem>>, vector<1x8x128xf32>
    tpu.vector_store %arg4[%c0_14, %c0_15, %c0_16], %25 {strides = array<i32>} : memref<1x8x128xf32, #tpu.memory_space<vmem>>, vector<1x8x128xf32>,
    %c0_17 = arith.constant 0 : index
    %c0_18 = arith.constant 0 : index
    %c0_19 = arith.constant 0 : index
    %27 = vector.load %arg5[%c0_17, %c0_18, %c0_19] : memref<1x8x128xf32, #tpu.memory_space<vmem>>, vector<1x8x128xf32>
    %28 = vector.shape_cast %20 : vector<8x128xf32> to vector<1x8x128xf32>
    %cst_20 = arith.constant dense<0.000000e+00> : vector<8x128xf32>
    %29 = vector.multi_reduction <add>, %28, %cst_20 [0] : vector<1x8x128xf32> to vector<8x128xf32>
    %30 = vector.shape_cast %29 : vector<8x128xf32> to vector<1x8x128xf32>
    %31 = arith.addf %27, %30 : vector<1x8x128xf32>
    %c0_21 = arith.constant 0 : index
    %c0_22 = arith.constant 0 : index
    %c0_23 = arith.constant 0 : index
    %32 = vector.load %arg5[%c0_21, %c0_22, %c0_23] : memref<1x8x128xf32, #tpu.memory_space<vmem>>, vector<1x8x128xf32>
    tpu.vector_store %arg5[%c0_21, %c0_22, %c0_23], %31 {strides = array<i32>} : memref<1x8x128xf32, #tpu.memory_space<vmem>>, vector<1x8x128xf32>,
    return
  }
  func.func @transform_0(%arg0: i32, %arg1: i32) -> (i32, i32) {
    %c1_i32 = arith.constant 1 : i32
    %0 = arith.muli %arg0, %c1_i32 : i32
    %1 = arith.addi %0, %arg1 : i32
    %c0_i32 = arith.constant 0 : i32
    %2 = arith.minsi %1, %c0_i32 : i32
    %c0_i32_0 = arith.constant 0 : i32
    %c0_i32_1 = arith.constant 0 : i32
    return %2, %c0_i32_0 : i32, i32
  }
  func.func @transform_1(%arg0: i32, %arg1: i32) -> (i32, i32) {
    %c1_i32 = arith.constant 1 : i32
    %0 = arith.muli %arg0, %c1_i32 : i32
    %1 = arith.addi %0, %arg1 : i32
    %c0_i32 = arith.constant 0 : i32
    %2 = arith.minsi %1, %c0_i32 : i32
    %c0_i32_0 = arith.constant 0 : i32
    %c0_i32_1 = arith.constant 0 : i32
    return %2, %c0_i32_0 : i32, i32
  }
  func.func @transform_2(%arg0: i32, %arg1: i32) -> (i32, i32, i32) {
    %c0_i32 = arith.constant 0 : i32
    %c0_i32_0 = arith.constant 0 : i32
    %c0_i32_1 = arith.constant 0 : i32
    return %arg0, %c0_i32, %c0_i32_0 : i32, i32, i32
  }
  func.func @transform_3(%arg0: i32, %arg1: i32) -> (i32, i32, i32) {
    %c0_i32 = arith.constant 0 : i32
    %c0_i32_0 = arith.constant 0 : i32
    %c0_i32_1 = arith.constant 0 : i32
    return %arg0, %c0_i32, %c0_i32_0 : i32, i32, i32
  }
}

</mosaic_0001>

<bundles_post_ra>
// kernel: mse_log_loss.1
= control target key start
LH: loop header
LB: loop body
LE: loop exit
PB: predicated region body
PF: predicated region fallthrough
CT: control target
= control target key end

     0   :  { %v119_v2 = vmov 0.0   ;;  %s154_s1 = inlined_call_operand.vmem [shape: f32[8,128], index: 1, kind: input, shape index: {}]   ;;  %s155_s0 = inlined_call_operand.vmem [shape: f32[8,128], index: 0, kind: input, shape index: {}]   ;;  %s156_s3 = inlined_call_operand.vmem [shape: f32[1,8,128], index: 3, kind: output, shape index: {1}]   ;;  %s157_s2 = inlined_call_operand.vmem [shape: f32[1,8,128], index: 2, kind: output, shape index: {0}]  }
   0x1   :  { %v75_v0 = vld [vmem:[%s154_s1] sm:$0xff] }
   0x2   :  { %v77_v1 = vadd.f32 1e-06, %v75_v0  ;;  %vm82_vm0 = vcmp.gt.f32.partialorder %v75_v0, 0.0  ;;  %v73_v4 = vld [vmem:[%s155_s0] sm:$0xff] }
   0x3   :  { %v85_v3 = vsel %vm82_vm0, 1.0, %v119_v2  ;;  %v74_v5 = vmax.f32 %v73_v4, 0.0 }
   0x4   :  { %115 = vrcp.f32 %v77_v1  ;;  %93 = vst [vmem:[%s156_s3] sm:$0xff] %v85_v3 }
   0x5   :  { %v76_v6 = vadd.f32 1e-06, %v74_v5 }
   0xe   :  { %v116_v7 = vpop.eup %115 }
   0xf   :  { %v79_v8 = vmul.f32 %v116_v7, %v76_v6 }
  0x11   :  { %117 = vlog2.f32 %v79_v8 }
  0x1b   :  { %v118_v9 = vpop.eup %117 }
  0x1c   :  { %v81_v10 = vmul.f32 0.6931472, %v118_v9 }
  0x1e   :  { %v83_v11 = vmul.f32 %v81_v10, %v81_v10 }
  0x20   :  { %v84_v12 = vsel %vm82_vm0, %v83_v11, 0.0 }
  0x21   :  { %89 = vst [vmem:[%s157_s2] sm:$0xff] %v84_v12 }

</bundles_post_ra>
